<compile_context>
chip_gen: v5e
topology: v5e:2x2
jax: 0.10.0
libtpu: 0.0.40
codegen_flags: <defaults>
</compile_context>

<pallas_src>
from functools import partial

import jax
import jax.numpy as jnp
import numpy as np
from jax.experimental import pallas as pl
from jax.experimental.pallas import tpu as pltpu

_LANE = 128
_SQRT_2_OVER_PI = 0.7978845608028654
_VMEM_LIMIT = 32 * 1024 * 1024  # safe on v5e/v6e (128 MiB) and v7x (64 MiB)


def _round_up(x, m):
    return ((x + m - 1) // m) * m


def _pick_co_tile(co):
    """Output-channel tile: a multiple of 8 dividing co, else the full dim."""
    if co % 8 != 0:
        return co
    for cand in (32, 16, 8):
        if co % cand == 0:
            return cand
    return co


def _pick_lane_tile(n, ci, co, budget=_VMEM_LIMIT // 2):
    """Largest multiple of 128 dividing n whose double-buffered tiles fit budget."""
    if n % _LANE != 0:
        return n
    per_lane = (ci + 2 * co) * 4 * 2        # x + spec + out, f32, double buffered
    t_max = max(_LANE, min(n, budget // per_lane, 8192))
    t = t_max - (t_max % _LANE)
    while t >= _LANE:
        if n % t == 0:
            return t
        t -= _LANE
    return n


# -----------------------------------------------------------------------------
# Kernel 1: fused lo/hi complex mode mixing
#   out[b, o, m] = sum_i x[b, i, m] * w[i, o, m]   (complex, split re/im)
# Layouts:  x  : (Ci, B, 1, Mp)      (Mp = modes padded to a multiple of 128)
#           w  : (Ci, Co, Mp)        (resident across the inner B grid axis)
#           out: (B, Co, Mp)
# Grid: (Co // co_t, B), both "parallel".
# -----------------------------------------------------------------------------
def _spectral_mix_kernel(xr_ref, xi_ref, wr_ref, wi_ref, or_ref, oi_ref):
    ci, co_t, mp = wr_ref.shape

    def body(i, carry):
        acc_r, acc_i = carry
        xr = xr_ref[i][0]          # (1, Mp)  -- dynamic load along leading axis
        xi = xi_ref[i][0]          # (1, Mp)
        wr = wr_ref[i]             # (co_t, Mp)
        wi = wi_ref[i]             # (co_t, Mp)
        acc_r = acc_r + xr * wr - xi * wi
        acc_i = acc_i + xr * wi + xi * wr
        return acc_r, acc_i

    zero = jnp.zeros((co_t, mp), jnp.float32)
    unroll = True if ci <= 16 else 8   # bounded unroll for large channel counts
    acc_r, acc_i = jax.lax.fori_loop(0, ci, body, (zero, zero), unroll=unroll)
    or_ref[0] = acc_r
    oi_ref[0] = acc_i


def spectral_mix(xr, xi, wr, wi):
    ci, b, _, mp = xr.shape
    co = wr.shape[1]
    co_t = _pick_co_tile(co)
    n_co = co // co_t
    out_shape = (jax.ShapeDtypeStruct((b, co, mp), jnp.float32),
                 jax.ShapeDtypeStruct((b, co, mp), jnp.float32))
    return pl.pallas_call(
        _spectral_mix_kernel,
        out_shape=out_shape,
        grid=(n_co, b),                       # B innermost -> weights stay resident
        in_specs=[
            pl.BlockSpec((ci, 1, 1, mp), lambda c, bb: (0, bb, 0, 0)),
            pl.BlockSpec((ci, 1, 1, mp), lambda c, bb: (0, bb, 0, 0)),
            pl.BlockSpec((ci, co_t, mp), lambda c, bb: (0, c, 0)),
            pl.BlockSpec((ci, co_t, mp), lambda c, bb: (0, c, 0)),
        ],
        out_specs=[
            pl.BlockSpec((1, co_t, mp), lambda c, bb: (bb, c, 0)),
            pl.BlockSpec((1, co_t, mp), lambda c, bb: (bb, c, 0)),
        ],
        compiler_params=pltpu.CompilerParams(
            dimension_semantics=("parallel", "parallel"),
            vmem_limit_bytes=_VMEM_LIMIT),
    )(xr, xi, wr, wi)


# -----------------------------------------------------------------------------
# Kernel 2: 1x1 conv (channel matmul, bf16 MXU / f32 acc) + bias + spectral
#           branch + GELU(tanh), tiled over the B*H*W lane axis.
# -----------------------------------------------------------------------------
def _pw_add_gelu_kernel(x_ref, spec_ref, w_ref, b_ref, o_ref):
    x = x_ref[...]                                   # (Ci, T) f32
    spec = spec_ref[...]                             # (Co, T) f32
    w = w_ref[...]                                   # (Co, Ci) bf16
    b = b_ref[...]                                   # (Co, 1) f32

    y = jnp.dot(w, x.astype(jnp.bfloat16),
                preferred_element_type=jnp.float32)  # MXU, f32 accumulate
    y = y + b + spec                                 # f32 epilogue
    c = _SQRT_2_OVER_PI
    o_ref[...] = 0.5 * y * (1.0 + jnp.tanh(c * (y + 0.044715 * (y * y * y))))


def pw_add_gelu(x, spec, w_bf16, b):
    ci, n = x.shape
    co = w_bf16.shape[0]
    t = _pick_lane_tile(n, ci, co)
    return pl.pallas_call(
        _pw_add_gelu_kernel,
        out_shape=jax.ShapeDtypeStruct((co, n), jnp.float32),
        grid=(n // t,),
        in_specs=[
            pl.BlockSpec((ci, t), lambda i: (0, i)),
            pl.BlockSpec((co, t), lambda i: (0, i)),
            pl.BlockSpec((co, ci), lambda i: (0, 0)),   # resident
            pl.BlockSpec((co, 1), lambda i: (0, 0)),    # resident
        ],
        out_specs=pl.BlockSpec((co, t), lambda i: (0, i)),
        compiler_params=pltpu.CompilerParams(
            dimension_semantics=("parallel",),
            vmem_limit_bytes=_VMEM_LIMIT),
    )(x, spec, w_bf16, b)


# -----------------------------------------------------------------------------
# Host-side, once-per-parameter-set preparation (outside the jitted forward):
#   * fuse + flatten + lane-pad the lo/hi spectral weights
#   * cast the pointwise weight to bf16 (kernel accumulates in f32)
# -----------------------------------------------------------------------------
def prepare_layer_params(params):
    wr1, wi1, wr2, wi2, w_pw, b_pw = params
    c = wr1.shape[0]
    m1, m2 = wr1.shape[-2], wr1.shape[-1]
    m = 2 * m1 * m2
    mp = _round_up(m, _LANE)
    wpad = ((0, 0), (0, 0), (0, mp - m))
    wr = jnp.pad(jnp.concatenate([wr1, wr2], axis=2).reshape(c, c, m), wpad)
    wi = jnp.pad(jnp.concatenate([wi1, wi2], axis=2).reshape(c, c, m), wpad)
    return (wr, wi, w_pw.astype(jnp.bfloat16), b_pw)


# -----------------------------------------------------------------------------
# Fourier layer + FNO block (JAX glue around the Pallas kernels)
# Activations are channel-major (C, B, H, W) throughout the block.
# -----------------------------------------------------------------------------
def fourier_layer_apply(x_cb, prep, m1, m2):
    wr, wi, w_pw_bf16, b_pw = prep
    c, b, h, w = x_cb.shape
    wf = w // 2 + 1
    m = 2 * m1 * m2
    mp = wr.shape[-1]

    # ---- spectral branch --------------------------------------------------
    # TODO(synk): FFTs in plain JAX (no Pallas TPU FFT primitive).
    x_ft = jnp.fft.rfft2(x_cb)                                    # (C,B,H,Wf)
    corner = jnp.concatenate(
        [x_ft[:, :, :m1, :m2], x_ft[:, :, h - m1:, :m2]], axis=2)  # (C,B,2m1,m2)
    corner = corner.reshape(c, b, m)
    pad = ((0, 0), (0, 0), (0, mp - m))
    xr = jnp.pad(jnp.real(corner), pad).reshape(c, b, 1, mp)
    xi = jnp.pad(jnp.imag(corner), pad).reshape(c, b, 1, mp)

    out_r, out_i = spectral_mix(xr, xi, wr, wi)                   # (B,C,Mp) x2

    out_c = jax.lax.complex(out_r[:, :, :m], out_i[:, :, :m])
    out_c = jnp.transpose(out_c.reshape(b, c, 2 * m1, m2), (1, 0, 2, 3))
    mid = jnp.zeros((c, b, h - 2 * m1, m2), out_c.dtype)
    col = jnp.concatenate([out_c[:, :, :m1, :], mid, out_c[:, :, m1:, :]], axis=2)
    out_ft = jnp.pad(col, ((0, 0), (0, 0), (0, 0), (0, wf - m2)))
    x_spec = jnp.fft.irfft2(out_ft, s=(h, w))                     # (C,B,H,W) f32

    # ---- pointwise conv + bias + spectral add + GELU (Pallas) --------------
    n = b * h * w
    y = pw_add_gelu(x_cb.reshape(c, n), x_spec.reshape(c, n), w_pw_bf16, b_pw)
    return y.reshape(c, b, h, w)


@partial(jax.jit, static_argnames=("m1", "m2"))
def fno_block_forward(x, prepared_layers, m1, m2):
    # one transpose to channel-major for the whole block, one back at the end
    x_cb = jnp.transpose(x, (1, 0, 2, 3))
    for prep in prepared_layers:
        x_cb = fourier_layer_apply(x_cb, prep, m1, m2)
    return jnp.transpose(x_cb, (1, 0, 2, 3))


# -----------------------------------------------------------------------------
# Pure-JAX reference (for correctness check)
# -----------------------------------------------------------------------------
def reference_forward(x, layer_params):
    def layer(x, params):
        wr1, wi1, wr2, wi2, w_pw, b_pw = params
        w1 = wr1 + 1j * wi1
        w2 = wr2 + 1j * wi2
        bsz, c, h, w = x.shape
        m1, m2 = wr1.shape[-2], wr1.shape[-1]
        x_ft = jnp.fft.rfft2(x)
        out_ft = jnp.zeros_like(x_ft)
        out_ft = out_ft.at[:, :, :m1, :m2].set(
            jnp.einsum('bixy,ioxy->boxy', x_ft[:, :, :m1, :m2], w1))
        out_ft = out_ft.at[:, :, h - m1:, :m2].set(
            jnp.einsum('bixy,ioxy->boxy', x_ft[:, :, h - m1:, :m2], w2))
        x_spec = jnp.fft.irfft2(out_ft, s=(h, w))
        y = (jnp.einsum('oi,bihw->bohw', w_pw, x)
             + b_pw.reshape(1, c, 1, 1) + x_spec)
        cc = _SQRT_2_OVER_PI
        return 0.5 * y * (1.0 + jnp.tanh(cc * (y + 0.044715 * y ** 3)))

    for params in layer_params:
        x = layer(x, params)
    return x


def init_params(key, c, modes1, modes2):
    k1, k2, k3, k4, k5, k6 = jax.random.split(key, 6)
    scale = 1.0 / (c * c)
    shape = (c, c, modes1, modes2)
    wr1 = scale * jax.random.uniform(k1, shape, jnp.float32)
    wi1 = scale * jax.random.uniform(k2, shape, jnp.float32)
    wr2 = scale * jax.random.uniform(k3, shape, jnp.float32)
    wi2 = scale * jax.random.uniform(k4, shape, jnp.float32)
    bound = 1.0 / np.sqrt(c)
    w_pw = jax.random.uniform(k5, (c, c), jnp.float32, -bound, bound)
    b_pw = jax.random.uniform(k6, (c, 1), jnp.float32, -bound, bound)
    return (wr1, wi1, wr2, wi2, w_pw, b_pw)


if __name__ == "__main__":
    B, C, H, W = 2, 4, 16, 16
    modes1 = modes2 = 4
    num_layers = 2

    key = jax.random.PRNGKey(0)
    kx, kp = jax.random.split(key)
    x = jax.random.normal(kx, (B, C, H, W), jnp.float32)

    # copy.deepcopy semantics: every layer starts from identical parameters
    # (the API still supports diverged per-layer params).
    params = init_params(kp, C, modes1, modes2)
    layer_params = tuple(params for _ in range(num_layers))

    # Parameter prep (flatten/pad spectral weights, bf16 cast) done ONCE here,
    # outside the jitted forward.
    prepared = tuple(prepare_layer_params(p) for p in layer_params)
    prepared = jax.block_until_ready(prepared)

    out = fno_block_forward(x, prepared, modes1, modes2)
    out = jax.block_until_ready(out)

    ref = reference_forward(x, layer_params)
    # tolerance accounts for the bf16-input / f32-accumulate pointwise matmul
    np.testing.assert_allclose(np.asarray(out), np.asarray(ref),
                               rtol=2e-2, atol=2e-2)
    print("KERNEL_OK")
</pallas_src>

<mosaic_0001>
module attributes {stable_mosaic.version = 11 : i64} {
  func.func @_spectral_mix_kernel(%arg0: i32, %arg1: i32, %arg2: memref<4x1x1x128xf32, #tpu.memory_space<vmem>>, %arg3: memref<4x1x1x128xf32, #tpu.memory_space<vmem>>, %arg4: memref<4x4x128xf32, #tpu.memory_space<vmem>>, %arg5: memref<4x4x128xf32, #tpu.memory_space<vmem>>, %arg6: memref<1x4x128xf32, #tpu.memory_space<vmem>>, %arg7: memref<1x4x128xf32, #tpu.memory_space<vmem>>) attributes {dimension_semantics = [#tpu.dimension_semantics<parallel>, #tpu.dimension_semantics<parallel>], iteration_bounds = array<i64: 1, 2>, scalar_prefetch = 0 : i64, scratch_operands = 0 : i64, tpu.core_type = #tpu.core_type<tc>, window_params = [{transform_indices = @transform_0, window_bounds = array<i64: 4, 1, 1, 128>}, {transform_indices = @transform_1, window_bounds = array<i64: 4, 1, 1, 128>}, {transform_indices = @transform_2, window_bounds = array<i64: 4, 4, 128>}, {transform_indices = @transform_3, window_bounds = array<i64: 4, 4, 128>}, {transform_indices = @transform_4, window_bounds = array<i64: 1, 4, 128>}, {transform_indices = @transform_5, window_bounds = array<i64: 1, 4, 128>}]} {
    %cst = arith.constant 0.000000e+00 : f32
    %0 = vector.broadcast %cst : f32 to vector<4x128xf32>
    %c0_i32 = arith.constant 0 : i32
    %1 = arith.index_cast %c0_i32 : i32 to index
    %c0 = arith.constant 0 : index
    %c0_0 = arith.constant 0 : index
    %c0_1 = arith.constant 0 : index
    %2 = vector.load %arg2[%1, %c0, %c0_0, %c0_1] : memref<4x1x1x128xf32, #tpu.memory_space<vmem>>, vector<1x1x1x128xf32>
    %3 = vector.shape_cast %2 : vector<1x1x1x128xf32> to vector<1x1x128xf32>
    %4 = vector.shape_cast %3 : vector<1x1x128xf32> to vector<1x128xf32>
    %5 = arith.index_cast %c0_i32 : i32 to index
    %c0_2 = arith.constant 0 : index
    %c0_3 = arith.constant 0 : index
    %c0_4 = arith.constant 0 : index
    %6 = vector.load %arg3[%5, %c0_2, %c0_3, %c0_4] : memref<4x1x1x128xf32, #tpu.memory_space<vmem>>, vector<1x1x1x128xf32>
    %7 = vector.shape_cast %6 : vector<1x1x1x128xf32> to vector<1x1x128xf32>
    %8 = vector.shape_cast %7 : vector<1x1x128xf32> to vector<1x128xf32>
    %9 = arith.index_cast %c0_i32 : i32 to index
    %c0_5 = arith.constant 0 : index
    %c0_6 = arith.constant 0 : index
    %10 = vector.load %arg4[%9, %c0_5, %c0_6] : memref<4x4x128xf32, #tpu.memory_space<vmem>>, vector<1x4x128xf32>
    %11 = vector.shape_cast %10 : vector<1x4x128xf32> to vector<4x128xf32>
    %12 = arith.index_cast %c0_i32 : i32 to index
    %c0_7 = arith.constant 0 : index
    %c0_8 = arith.constant 0 : index
    %13 = vector.load %arg5[%12, %c0_7, %c0_8] : memref<4x4x128xf32, #tpu.memory_space<vmem>>, vector<1x4x128xf32>
    %14 = vector.shape_cast %13 : vector<1x4x128xf32> to vector<4x128xf32>
    %15 = vector.broadcast %4 : vector<1x128xf32> to vector<4x128xf32>
    %16 = arith.mulf %15, %11 : vector<4x128xf32>
    %17 = arith.addf %0, %16 : vector<4x128xf32>
    %18 = vector.broadcast %8 : vector<1x128xf32> to vector<4x128xf32>
    %19 = arith.mulf %18, %14 : vector<4x128xf32>
    %20 = arith.subf %17, %19 : vector<4x128xf32>
    %21 = vector.broadcast %4 : vector<1x128xf32> to vector<4x128xf32>
    %22 = arith.mulf %21, %14 : vector<4x128xf32>
    %23 = arith.addf %0, %22 : vector<4x128xf32>
    %24 = vector.broadcast %8 : vector<1x128xf32> to vector<4x128xf32>
    %25 = arith.mulf %24, %11 : vector<4x128xf32>
    %26 = arith.addf %23, %25 : vector<4x128xf32>
    %c1_i32 = arith.constant 1 : i32
    %27 = arith.index_cast %c1_i32 : i32 to index
    %c0_9 = arith.constant 0 : index
    %c0_10 = arith.constant 0 : index
    %c0_11 = arith.constant 0 : index
    %28 = vector.load %arg2[%27, %c0_9, %c0_10, %c0_11] : memref<4x1x1x128xf32, #tpu.memory_space<vmem>>, vector<1x1x1x128xf32>
    %29 = vector.shape_cast %28 : vector<1x1x1x128xf32> to vector<1x1x128xf32>
    %30 = vector.shape_cast %29 : vector<1x1x128xf32> to vector<1x128xf32>
    %31 = arith.index_cast %c1_i32 : i32 to index
    %c0_12 = arith.constant 0 : index
    %c0_13 = arith.constant 0 : index
    %c0_14 = arith.constant 0 : index
    %32 = vector.load %arg3[%31, %c0_12, %c0_13, %c0_14] : memref<4x1x1x128xf32, #tpu.memory_space<vmem>>, vector<1x1x1x128xf32>
    %33 = vector.shape_cast %32 : vector<1x1x1x128xf32> to vector<1x1x128xf32>
    %34 = vector.shape_cast %33 : vector<1x1x128xf32> to vector<1x128xf32>
    %35 = arith.index_cast %c1_i32 : i32 to index
    %c0_15 = arith.constant 0 : index
    %c0_16 = arith.constant 0 : index
    %36 = vector.load %arg4[%35, %c0_15, %c0_16] : memref<4x4x128xf32, #tpu.memory_space<vmem>>, vector<1x4x128xf32>
    %37 = vector.shape_cast %36 : vector<1x4x128xf32> to vector<4x128xf32>
    %38 = arith.index_cast %c1_i32 : i32 to index
    %c0_17 = arith.constant 0 : index
    %c0_18 = arith.constant 0 : index
    %39 = vector.load %arg5[%38, %c0_17, %c0_18] : memref<4x4x128xf32, #tpu.memory_space<vmem>>, vector<1x4x128xf32>
    %40 = vector.shape_cast %39 : vector<1x4x128xf32> to vector<4x128xf32>
    %41 = vector.broadcast %30 : vector<1x128xf32> to vector<4x128xf32>
    %42 = arith.mulf %41, %37 : vector<4x128xf32>
    %43 = arith.addf %20, %42 : vector<4x128xf32>
    %44 = vector.broadcast %34 : vector<1x128xf32> to vector<4x128xf32>
    %45 = arith.mulf %44, %40 : vector<4x128xf32>
    %46 = arith.subf %43, %45 : vector<4x128xf32>
    %47 = vector.broadcast %30 : vector<1x128xf32> to vector<4x128xf32>
    %48 = arith.mulf %47, %40 : vector<4x128xf32>
    %49 = arith.addf %26, %48 : vector<4x128xf32>
    %50 = vector.broadcast %34 : vector<1x128xf32> to vector<4x128xf32>
    %51 = arith.mulf %50, %37 : vector<4x128xf32>
    %52 = arith.addf %49, %51 : vector<4x128xf32>
    %c2_i32 = arith.constant 2 : i32
    %53 = arith.index_cast %c2_i32 : i32 to index
    %c0_19 = arith.constant 0 : index
    %c0_20 = arith.constant 0 : index
    %c0_21 = arith.constant 0 : index
    %54 = vector.load %arg2[%53, %c0_19, %c0_20, %c0_21] : memref<4x1x1x128xf32, #tpu.memory_space<vmem>>, vector<1x1x1x128xf32>
    %55 = vector.shape_cast %54 : vector<1x1x1x128xf32> to vector<1x1x128xf32>
    %56 = vector.shape_cast %55 : vector<1x1x128xf32> to vector<1x128xf32>
    %57 = arith.index_cast %c2_i32 : i32 to index
    %c0_22 = arith.constant 0 : index
    %c0_23 = arith.constant 0 : index
    %c0_24 = arith.constant 0 : index
    %58 = vector.load %arg3[%57, %c0_22, %c0_23, %c0_24] : memref<4x1x1x128xf32, #tpu.memory_space<vmem>>, vector<1x1x1x128xf32>
    %59 = vector.shape_cast %58 : vector<1x1x1x128xf32> to vector<1x1x128xf32>
    %60 = vector.shape_cast %59 : vector<1x1x128xf32> to vector<1x128xf32>
    %61 = arith.index_cast %c2_i32 : i32 to index
    %c0_25 = arith.constant 0 : index
    %c0_26 = arith.constant 0 : index
    %62 = vector.load %arg4[%61, %c0_25, %c0_26] : memref<4x4x128xf32, #tpu.memory_space<vmem>>, vector<1x4x128xf32>
    %63 = vector.shape_cast %62 : vector<1x4x128xf32> to vector<4x128xf32>
    %64 = arith.index_cast %c2_i32 : i32 to index
    %c0_27 = arith.constant 0 : index
    %c0_28 = arith.constant 0 : index
    %65 = vector.load %arg5[%64, %c0_27, %c0_28] : memref<4x4x128xf32, #tpu.memory_space<vmem>>, vector<1x4x128xf32>
    %66 = vector.shape_cast %65 : vector<1x4x128xf32> to vector<4x128xf32>
    %67 = vector.broadcast %56 : vector<1x128xf32> to vector<4x128xf32>
    %68 = arith.mulf %67, %63 : vector<4x128xf32>
    %69 = arith.addf %46, %68 : vector<4x128xf32>
    %70 = vector.broadcast %60 : vector<1x128xf32> to vector<4x128xf32>
    %71 = arith.mulf %70, %66 : vector<4x128xf32>
    %72 = arith.subf %69, %71 : vector<4x128xf32>
    %73 = vector.broadcast %56 : vector<1x128xf32> to vector<4x128xf32>
    %74 = arith.mulf %73, %66 : vector<4x128xf32>
    %75 = arith.addf %52, %74 : vector<4x128xf32>
    %76 = vector.broadcast %60 : vector<1x128xf32> to vector<4x128xf32>
    %77 = arith.mulf %76, %63 : vector<4x128xf32>
    %78 = arith.addf %75, %77 : vector<4x128xf32>
    %c3_i32 = arith.constant 3 : i32
    %79 = arith.index_cast %c3_i32 : i32 to index
    %c0_29 = arith.constant 0 : index
    %c0_30 = arith.constant 0 : index
    %c0_31 = arith.constant 0 : index
    %80 = vector.load %arg2[%79, %c0_29, %c0_30, %c0_31] : memref<4x1x1x128xf32, #tpu.memory_space<vmem>>, vector<1x1x1x128xf32>
    %81 = vector.shape_cast %80 : vector<1x1x1x128xf32> to vector<1x1x128xf32>
    %82 = vector.shape_cast %81 : vector<1x1x128xf32> to vector<1x128xf32>
    %83 = arith.index_cast %c3_i32 : i32 to index
    %c0_32 = arith.constant 0 : index
    %c0_33 = arith.constant 0 : index
    %c0_34 = arith.constant 0 : index
    %84 = vector.load %arg3[%83, %c0_32, %c0_33, %c0_34] : memref<4x1x1x128xf32, #tpu.memory_space<vmem>>, vector<1x1x1x128xf32>
    %85 = vector.shape_cast %84 : vector<1x1x1x128xf32> to vector<1x1x128xf32>
    %86 = vector.shape_cast %85 : vector<1x1x128xf32> to vector<1x128xf32>
    %87 = arith.index_cast %c3_i32 : i32 to index
    %c0_35 = arith.constant 0 : index
    %c0_36 = arith.constant 0 : index
    %88 = vector.load %arg4[%87, %c0_35, %c0_36] : memref<4x4x128xf32, #tpu.memory_space<vmem>>, vector<1x4x128xf32>
    %89 = vector.shape_cast %88 : vector<1x4x128xf32> to vector<4x128xf32>
    %90 = arith.index_cast %c3_i32 : i32 to index
    %c0_37 = arith.constant 0 : index
    %c0_38 = arith.constant 0 : index
    %91 = vector.load %arg5[%90, %c0_37, %c0_38] : memref<4x4x128xf32, #tpu.memory_space<vmem>>, vector<1x4x128xf32>
    %92 = vector.shape_cast %91 : vector<1x4x128xf32> to vector<4x128xf32>
    %93 = vector.broadcast %82 : vector<1x128xf32> to vector<4x128xf32>
    %94 = arith.mulf %93, %89 : vector<4x128xf32>
    %95 = arith.addf %72, %94 : vector<4x128xf32>
    %96 = vector.broadcast %86 : vector<1x128xf32> to vector<4x128xf32>
    %97 = arith.mulf %96, %92 : vector<4x128xf32>
    %98 = arith.subf %95, %97 : vector<4x128xf32>
    %99 = vector.broadcast %82 : vector<1x128xf32> to vector<4x128xf32>
    %100 = arith.mulf %99, %92 : vector<4x128xf32>
    %101 = arith.addf %78, %100 : vector<4x128xf32>
    %102 = vector.broadcast %86 : vector<1x128xf32> to vector<4x128xf32>
    %103 = arith.mulf %102, %89 : vector<4x128xf32>
    %104 = arith.addf %101, %103 : vector<4x128xf32>
    %c4_i32 = arith.constant 4 : i32
    %c0_39 = arith.constant 0 : index
    %c0_40 = arith.constant 0 : index
    %c0_41 = arith.constant 0 : index
    %105 = vector.load %arg6[%c0_39, %c0_40, %c0_41] : memref<1x4x128xf32, #tpu.memory_space<vmem>>, vector<1x4x128xf32>
    %106 = vector.shape_cast %105 : vector<1x4x128xf32> to vector<4x128xf32>
    %107 = vector.shape_cast %98 : vector<4x128xf32> to vector<1x4x128xf32>
    tpu.vector_store %arg6[%c0_39, %c0_40, %c0_41], %107 {strides = array<i32>} : memref<1x4x128xf32, #tpu.memory_space<vmem>>, vector<1x4x128xf32>,
    %c0_42 = arith.constant 0 : index
    %c0_43 = arith.constant 0 : index
    %c0_44 = arith.constant 0 : index
    %108 = vector.load %arg7[%c0_42, %c0_43, %c0_44] : memref<1x4x128xf32, #tpu.memory_space<vmem>>, vector<1x4x128xf32>
    %109 = vector.shape_cast %108 : vector<1x4x128xf32> to vector<4x128xf32>
    %110 = vector.shape_cast %104 : vector<4x128xf32> to vector<1x4x128xf32>
    tpu.vector_store %arg7[%c0_42, %c0_43, %c0_44], %110 {strides = array<i32>} : memref<1x4x128xf32, #tpu.memory_space<vmem>>, vector<1x4x128xf32>,
    return
  }
  func.func @transform_0(%arg0: i32, %arg1: i32) -> (i32, i32, i32, i32) {
    %c0_i32 = arith.constant 0 : i32
    %c0_i32_0 = arith.constant 0 : i32
    %c0_i32_1 = arith.constant 0 : i32
    %c0_i32_2 = arith.constant 0 : i32
    return %c0_i32, %arg1, %c0_i32_0, %c0_i32_1 : i32, i32, i32, i32
  }
  func.func @transform_1(%arg0: i32, %arg1: i32) -> (i32, i32, i32, i32) {
    %c0_i32 = arith.constant 0 : i32
    %c0_i32_0 = arith.constant 0 : i32
    %c0_i32_1 = arith.constant 0 : i32
    %c0_i32_2 = arith.constant 0 : i32
    return %c0_i32, %arg1, %c0_i32_0, %c0_i32_1 : i32, i32, i32, i32
  }
  func.func @transform_2(%arg0: i32, %arg1: i32) -> (i32, i32, i32) {
    %c0_i32 = arith.constant 0 : i32
    %c0_i32_0 = arith.constant 0 : i32
    %c0_i32_1 = arith.constant 0 : i32
    return %c0_i32, %arg0, %c0_i32_0 : i32, i32, i32
  }
  func.func @transform_3(%arg0: i32, %arg1: i32) -> (i32, i32, i32) {
    %c0_i32 = arith.constant 0 : i32
    %c0_i32_0 = arith.constant 0 : i32
    %c0_i32_1 = arith.constant 0 : i32
    return %c0_i32, %arg0, %c0_i32_0 : i32, i32, i32
  }
  func.func @transform_4(%arg0: i32, %arg1: i32) -> (i32, i32, i32) {
    %c0_i32 = arith.constant 0 : i32
    %c0_i32_0 = arith.constant 0 : i32
    return %arg1, %arg0, %c0_i32 : i32, i32, i32
  }
  func.func @transform_5(%arg0: i32, %arg1: i32) -> (i32, i32, i32) {
    %c0_i32 = arith.constant 0 : i32
    %c0_i32_0 = arith.constant 0 : i32
    return %arg1, %arg0, %c0_i32 : i32, i32, i32
  }
}

module attributes {stable_mosaic.version = 11 : i64} {
  func.func @_pw_add_gelu_kernel(%arg0: i32, %arg1: memref<4x512xf32, #tpu.memory_space<vmem>>, %arg2: memref<4x512xf32, #tpu.memory_space<vmem>>, %arg3: memref<4x4xbf16, #tpu.memory_space<vmem>>, %arg4: memref<4x1xf32, #tpu.memory_space<vmem>>, %arg5: memref<4x512xf32, #tpu.memory_space<vmem>>) attributes {dimension_semantics = [#tpu.dimension_semantics<parallel>], iteration_bounds = array<i64: 1>, scalar_prefetch = 0 : i64, scratch_operands = 0 : i64, tpu.core_type = #tpu.core_type<tc>, window_params = [{transform_indices = @transform_0, window_bounds = array<i64: 4, 512>}, {transform_indices = @transform_1, window_bounds = array<i64: 4, 512>}, {pipeline_mode = #tpu.pipeline_mode<synchronous>, transform_indices = @transform_2, window_bounds = array<i64: 4, 4>}, {pipeline_mode = #tpu.pipeline_mode<synchronous>, transform_indices = @transform_3, window_bounds = array<i64: 4, 1>}, {transform_indices = @transform_4, window_bounds = array<i64: 4, 512>}]} {
    %c0 = arith.constant 0 : index
    %c0_0 = arith.constant 0 : index
    %0 = vector.load %arg1[%c0, %c0_0] : memref<4x512xf32, #tpu.memory_space<vmem>>, vector<4x512xf32>
    %c0_1 = arith.constant 0 : index
    %c0_2 = arith.constant 0 : index
    %1 = vector.load %arg2[%c0_1, %c0_2] : memref<4x512xf32, #tpu.memory_space<vmem>>, vector<4x512xf32>
    %c0_3 = arith.constant 0 : index
    %c0_4 = arith.constant 0 : index
    %2 = vector.load %arg3[%c0_3, %c0_4] : memref<4x4xbf16, #tpu.memory_space<vmem>>, vector<4x4xbf16>
    %c0_5 = arith.constant 0 : index
    %c0_6 = arith.constant 0 : index
    %3 = vector.load %arg4[%c0_5, %c0_6] : memref<4x1xf32, #tpu.memory_space<vmem>>, vector<4x1xf32>
    %4 = arith.truncf %0 : vector<4x512xf32> to vector<4x512xbf16>
    %cst = arith.constant dense<0.000000e+00> : vector<4x512xf32>
    %5 = tpu.matmul %2, %4, %cst {dimension_numbers = #tpu.dot_dimension_numbers<[1], [0], [0], [1], [0, 0, 1, 1], [], []>} : vector<4x4xbf16>, vector<4x512xbf16>, vector<4x512xf32> -> vector<4x512xf32>
    %6 = vector.broadcast %3 : vector<4x1xf32> to vector<4x512xf32>
    %7 = arith.addf %5, %6 : vector<4x512xf32>
    %8 = arith.addf %7, %1 : vector<4x512xf32>
    %cst_7 = arith.constant 5.000000e-01 : f32
    %9 = vector.broadcast %cst_7 : f32 to vector<4x512xf32>
    %10 = arith.mulf %9, %8 : vector<4x512xf32>
    %11 = arith.mulf %8, %8 : vector<4x512xf32>
    %12 = arith.mulf %11, %8 : vector<4x512xf32>
    %cst_8 = arith.constant 4.471500e-02 : f32
    %13 = vector.broadcast %cst_8 : f32 to vector<4x512xf32>
    %14 = arith.mulf %13, %12 : vector<4x512xf32>
    %15 = arith.addf %8, %14 : vector<4x512xf32>
    %cst_9 = arith.constant 0.797884583 : f32
    %16 = vector.broadcast %cst_9 : f32 to vector<4x512xf32>
    %17 = arith.mulf %16, %15 : vector<4x512xf32>
    %18 = math.tanh %17 : vector<4x512xf32>
    %cst_10 = arith.constant 1.000000e+00 : f32
    %19 = vector.broadcast %cst_10 : f32 to vector<4x512xf32>
    %20 = arith.addf %19, %18 : vector<4x512xf32>
    %21 = arith.mulf %10, %20 : vector<4x512xf32>
    %c0_11 = arith.constant 0 : index
    %c0_12 = arith.constant 0 : index
    %22 = vector.load %arg5[%c0_11, %c0_12] : memref<4x512xf32, #tpu.memory_space<vmem>>, vector<4x512xf32>
    tpu.vector_store %arg5[%c0_11, %c0_12], %21 {strides = array<i32>} : memref<4x512xf32, #tpu.memory_space<vmem>>, vector<4x512xf32>,
    return
  }
  func.func @transform_0(%arg0: i32) -> (i32, i32) {
    %c0_i32 = arith.constant 0 : i32
    %c0_i32_0 = arith.constant 0 : i32
    return %c0_i32, %arg0 : i32, i32
  }
  func.func @transform_1(%arg0: i32) -> (i32, i32) {
    %c0_i32 = arith.constant 0 : i32
    %c0_i32_0 = arith.constant 0 : i32
    return %c0_i32, %arg0 : i32, i32
  }
  func.func @transform_2(%arg0: i32) -> (i32, i32) {
    %c0_i32 = arith.constant 0 : i32
    %c0_i32_0 = arith.constant 0 : i32
    %c0_i32_1 = arith.constant 0 : i32
    return %c0_i32, %c0_i32_0 : i32, i32
  }
  func.func @transform_3(%arg0: i32) -> (i32, i32) {
    %c0_i32 = arith.constant 0 : i32
    %c0_i32_0 = arith.constant 0 : i32
    %c0_i32_1 = arith.constant 0 : i32
    return %c0_i32, %c0_i32_0 : i32, i32
  }
  func.func @transform_4(%arg0: i32) -> (i32, i32) {
    %c0_i32 = arith.constant 0 : i32
    %c0_i32_0 = arith.constant 0 : i32
    return %c0_i32, %arg0 : i32, i32
  }
}

</mosaic_0001>

<bundles_post_ra>
// kernel: reverse.5
= control target key start
LH: loop header
LB: loop body
LE: loop exit
PB: predicated region body
PF: predicated region fallthrough
CT: control target
= control target key end

     0   :  { %v72_v3 = vlaneseq  ;;  %v65_v6 = vld [vmem:[#allocation0 + $0x7] ss:$-1 sm:$0xff]  ;;  %v79_v8 = vld [vmem:[#allocation0 + $0x17] ss:$-1 sm:$0xff]  ;;  %s331_s0 = inlined_call_operand.vmem [shape: f32[4,2,16,7], index: 0, kind: input, shape index: {}]   ;;  %s332_s1 = inlined_call_operand.vmem [shape: f32[4,2,16,7], index: 1, kind: output, shape index: {}]  }
   0x1   :  { %v45_v0 = vld [vmem:[%s331_s0] sm:$0xff]  ;;  %v47_v1 = vld [vmem:[%s331_s0 + $0x8] sm:$0xff]  ;;  %v49_v2 = vld [vmem:[%s331_s0 + $0x10] sm:$0xff]  ;;  %v66_v12 = vrot.slane %v65_v6, 1  ;;  %v80_v13 = vrot.slane %v79_v8, 1 }
   0x2   :  { %46 = vst [vmem:[#allocation0 + $0x8] sm:$0xff] %v45_v0  ;;  %v51_v4 = vld [vmem:[%s331_s0 + $0x18] sm:$0xff]  ;;  %v53_v5 = vld [vmem:[%s331_s0 + $0x20] sm:$0xff]  ;;  %v55_v7 = vld [vmem:[%s331_s0 + $0x28] sm:$0xff]  ;;  %v73_v10 = vshrl.u32 %v72_v3, 7 }
   0x3   :  { %48 = vst [vmem:[#allocation0 + $0x18] sm:$0xff] %v47_v1  ;;  %v57_v9 = vld [vmem:[%s331_s0 + $0x30] sm:$0xff]  ;;  %v59_v11 = vld [vmem:[%s331_s0 + $0x38] sm:$0xff]  ;;  %v93_v14 = vld [vmem:[#allocation0 + $0x27] ss:$-1 sm:$0xff] }
   0x4   :  { %50 = vst [vmem:[#allocation0 + $0x28] sm:$0xff] %v49_v2  ;;  %vm74_vm0 = vcmp.lt.s32.totalorder %v73_v10, 7  ;;  %v107_v16 = vld [vmem:[#allocation0 + $0x37] ss:$-1 sm:$0xff]  ;;  %v94_v19 = vrot.slane %v93_v14, 1 }
   0x5   :  { %52 = vst [vmem:[#allocation0 + $0x38] sm:$0xff] %v51_v4  ;;  %v121_v22 = vld [vmem:[#allocation0 + $0x47] ss:$-1 sm:$0xff]  ;;  %v108_v24 = vrot.slane %v107_v16, 1  ;;  %v135_v28 = vld [vmem:[#allocation0 + $0x57] ss:$-1 sm:$0xff] }
   0x6   :  { %54 = vst [vmem:[#allocation0 + $0x48] sm:$0xff] %v53_v5  ;;  %v122_v29 = vrot.slane %v121_v22, 1  ;;  %v149_v32 = vld [vmem:[#allocation0 + $0x67] ss:$-1 sm:$0xff]  ;;  %v136_v33 = vrot.slane %v135_v28, 1 }
   0x7   :  { %56 = vst [vmem:[#allocation0 + $0x58] sm:$0xff] %v55_v7  ;;  %v163_v36 = vld [vmem:[#allocation0 + $0x77] ss:$-1 sm:$0xff]  ;;  %v150_v37 = vrot.slane %v149_v32, 1 }
   0x8   :  { %58 = vst [vmem:[#allocation0 + $0x68] sm:$0xff] %v57_v9  ;;  %v164_v40 = vrot.slane %v163_v36, 1 }
   0x9   :  { %60 = vst [vmem:[#allocation0 + $0x78] sm:$0xff] %v59_v11  ;;  %v70_v15 = vld [vmem:[#allocation0 + $0xf] ss:$-1 sm:$0xff] }
   0xa   :  { %67 = vst [vmem:[#allocation1] sm:$0xff] %v66_v12  ;;  %v71_v17 = vrot.slane %v70_v15, 1  ;;  %v84_v18 = vld [vmem:[#allocation0 + $0x1f] ss:$-1 sm:$0xff] }
   0xb   :  { %81 = vst [vmem:[#allocation1 + $0x8] sm:$0xff] %v80_v13  ;;  %v85_v20 = vrot.slane %v84_v18, 1  ;;  %v98_v21 = vld [vmem:[#allocation0 + $0x2f] ss:$-1 sm:$0xff] }
   0xc   :  { %75 = vst.msk [vmem:[#allocation1] sm:$0xff] %vm74_vm0, %v71_v17  ;;  %v99_v23 = vrot.slane %v98_v21, 1  ;;  %v112_v25 = vld [vmem:[#allocation0 + $0x3f] ss:$-1 sm:$0xff] }
   0xd   :  { %89 = vst.msk [vmem:[#allocation1 + $0x8] sm:$0xff] %vm74_vm0, %v85_v20  ;;  %v113_v26 = vrot.slane %v112_v25, 1  ;;  %v126_v27 = vld [vmem:[#allocation0 + $0x4f] ss:$-1 sm:$0xff] }
   0xe   :  { %95 = vst [vmem:[#allocation1 + $0x10] sm:$0xff] %v94_v19  ;;  %v140_v30 = vld [vmem:[#allocation0 + $0x5f] ss:$-1 sm:$0xff]  ;;  %v127_v31 = vrot.slane %v126_v27, 1 }
   0xf   :  { %103 = vst.msk [vmem:[#allocation1 + $0x10] sm:$0xff] %vm74_vm0, %v99_v23  ;;  %v154_v34 = vld [vmem:[#allocation0 + $0x6f] ss:$-1 sm:$0xff]  ;;  %v141_v35 = vrot.slane %v140_v30, 1 }
  0x10   :  { %109 = vst [vmem:[#allocation1 + $0x18] sm:$0xff] %v108_v24  ;;  %v168_v38 = vld [vmem:[#allocation0 + $0x7f] ss:$-1 sm:$0xff]  ;;  %v155_v39 = vrot.slane %v154_v34, 1 }
  0x11   :  { %117 = vst.msk [vmem:[#allocation1 + $0x18] sm:$0xff] %vm74_vm0, %v113_v26  ;;  %v169_v41 = vrot.slane %v168_v38, 1 }
  0x12   :  { %123 = vst [vmem:[#allocation1 + $0x20] sm:$0xff] %v122_v29 }
  0x13   :  { %131 = vst.msk [vmem:[#allocation1 + $0x20] sm:$0xff] %vm74_vm0, %v127_v31  ;;  %v216_v42 = vld [vmem:[#allocation1] sm:$0xff] }
  0x14   :  { %137 = vst [vmem:[#allocation1 + $0x28] sm:$0xff] %v136_v33  ;;  %v218_v43 = vld [vmem:[#allocation1 + $0x8] sm:$0xff] }
  0x15   :  { %145 = vst.msk [vmem:[#allocation1 + $0x28] sm:$0xff] %vm74_vm0, %v141_v35 }
  0x16   :  { %151 = vst [vmem:[#allocation1 + $0x30] sm:$0xff] %v150_v37  ;;  %v220_v44 = vld [vmem:[#allocation1 + $0x10] sm:$0xff] }
  0x17   :  { %159 = vst.msk [vmem:[#allocation1 + $0x30] sm:$0xff] %vm74_vm0, %v155_v39 }
  0x18   :  { %165 = vst [vmem:[#allocation1 + $0x38] sm:$0xff] %v164_v40  ;;  %v222_v45 = vld [vmem:[#allocation1 + $0x18] sm:$0xff] }
  0x19   :  { %173 = vst.msk [vmem:[#allocation1 + $0x38] sm:$0xff] %vm74_vm0, %v169_v41 }
  0x1a   :  { %217 = vst [vmem:[%s332_s1] sm:$0xff] %v216_v42  ;;  %v224_v46 = vld [vmem:[#allocation1 + $0x20] sm:$0xff] }
  0x1b   :  { %219 = vst [vmem:[%s332_s1 + $0x8] sm:$0xff] %v218_v43 }
  0x1c   :  { %221 = vst [vmem:[%s332_s1 + $0x10] sm:$0xff] %v220_v44  ;;  %v226_v47 = vld [vmem:[#allocation1 + $0x28] sm:$0xff] }
  0x1d   :  { %223 = vst [vmem:[%s332_s1 + $0x18] sm:$0xff] %v222_v45 }
  0x1e   :  { %225 = vst [vmem:[%s332_s1 + $0x20] sm:$0xff] %v224_v46  ;;  %v228_v48 = vld [vmem:[#allocation1 + $0x30] sm:$0xff] }
  0x1f   :  { %227 = vst [vmem:[%s332_s1 + $0x28] sm:$0xff] %v226_v47 }
  0x20   :  { %229 = vst [vmem:[%s332_s1 + $0x30] sm:$0xff] %v228_v48  ;;  %v230_v49 = vld [vmem:[#allocation1 + $0x38] sm:$0xff] }
  0x21   :  { %231 = vst [vmem:[%s332_s1 + $0x38] sm:$0xff] %v230_v49 }

// kernel: fno_block_forward.4
= control target key start
LH: loop header
LB: loop body
LE: loop exit
PB: predicated region body
PF: predicated region fallthrough
CT: control target
= control target key end

     0   :  { %s804_s18 = smov 0   ;;  %s806_s19 = smov 0   ;;  %s916_s0 = inlined_call_operand.vmem [shape: f32[4,2,1,128], index: 0, kind: input, shape index: {}]   ;;  %s917_s1 = inlined_call_operand.vmem [shape: f32[4,2,1,128], index: 1, kind: input, shape index: {}]   ;;  %s918_s2 = inlined_call_operand.vmem [shape: f32[4,4,128], index: 2, kind: input, shape index: {}]   ;;  %s919_s3 = inlined_call_operand.vmem [shape: f32[4,4,128], index: 3, kind: input, shape index: {}]   ;;  %s920_s4 = inlined_call_operand.vmem [shape: f32[2,4,128], index: 4, kind: output, shape index: {0}]   ;;  %s921_s5 = inlined_call_operand.vmem [shape: f32[2,4,128], index: 5, kind: output, shape index: {1}]  }
   0x1   :  { %s808_s20 = smov 0   ;;  %s810_s21 = smov 0  }
   0x2   :  { %s812_s22 = smov 0  }
   0x3 LB: > { %s25_s23 = sadd.s32 1, %s768_s21  ;;  %p42_p1 = scmp.ne.s32.totalorder %s760_s19, %s756_s18  ;;  %s772_s22 = sphi %s812_s22, %s16_s22   ;;  %s768_s21 = sphi %s810_s21, %s926_s21   ;;  %s764_s20 = sphi %s808_s20, %s925_s20   ;;  %s760_s19 = sphi %s806_s19, %s924_s19   ;;  %s756_s18 = sphi %s804_s18, %s923_s18  }
   0x4   : > { %p26_p0 = scmp.ge.s32.totalorder %s25_s23, 2  ;;  %p43_p2 = scmp.eq.s32.totalorder %s772_s22, 0 }
   0x5   : > { %s35_s26 = sadd.s32 1, %s760_s19  ;;  %p664_p5 = scmp.ge.s32.totalorder %s772_s22, 2 }
   0x6   : > { %s928_s23 = smov (%p26_p0, %s25_s23), 0  ;;  %p835_p3 = por %p43_p2, %p42_p1 }
   0x7   : > { %s32_s25 = ssub.s32 %s768_s21, %s928_s23  ;;  %216 = sbr.rel (%p664_p5) target bundleno = 28 (0x1c), region = 24 }
   0x8   : > { %p33_p4 = scmp.eq.s32.totalorder %s32_s25, 0 }
   0xa   : > { %s843_s27 = scalar_select %p33_p4, %s760_s19, %s35_s26  }
   0xc   : > { %219 = sbr.rel (!%p835_p3) target bundleno = 20 (0x14), region = 28  ;;  %s221_s28 = sand.u32 (%p835_p3), 1, %s760_s19  }
   0xd   : > { %s224_s6 = scalar_lea.vmem (%p835_p3), %s916_s0, %s768_s21  ;;  %s665_s7 = sshll.u32 (%p835_p3), %s221_s28, 2 }
   0xe   : > { %v241_v0 = vld [vmem:[%s224_s6] sm:$0x1] (%p835_p3)  ;;  %v243_v1 = vld [vmem:[%s224_s6 + $0x2] sm:$0x1] (%p835_p3)  ;;  %v245_v2 = vld [vmem:[%s224_s6 + $0x4] sm:$0x1] (%p835_p3) }
   0xf   : > { %s223_s8 = scalar_lea.vmem (%p835_p3), [#allocation2], %s665_s7  ;;  %v247_v3 = vld [vmem:[%s224_s6 + $0x6] sm:$0x1] (%p835_p3) }
  0x10   : > { %242 = vst [vmem:[%s223_s8] sm:$0x1] (%p835_p3), %v241_v0 }
  0x11   : > { %244 = vst [vmem:[%s223_s8 + $0x1] sm:$0x1] %v243_v1 }
  0x12   : > { %246 = vst [vmem:[%s223_s8 + $0x2] sm:$0x1] %v245_v2 }
  0x13   : > { %248 = vst [vmem:[%s223_s8 + $0x3] sm:$0x1] %v247_v3 }
  0x14 PF: > { %272 = sbr.rel (!%p835_p3) target bundleno = 28 (0x1c), region = 62  ;;  %s274_s9 = sand.u32 (%p835_p3), 1, %s760_s19  }
  0x15   : > { %s277_s12 = scalar_lea.vmem (%p835_p3), %s917_s1, %s768_s21  ;;  %s666_s13 = sshll.u32 (%p835_p3), %s274_s9, 2 }
  0x16   : > { %v294_v4 = vld [vmem:[%s277_s12] sm:$0x1] (%p835_p3)  ;;  %v296_v5 = vld [vmem:[%s277_s12 + $0x2] sm:$0x1] (%p835_p3)  ;;  %v298_v6 = vld [vmem:[%s277_s12 + $0x4] sm:$0x1] (%p835_p3) }
  0x17   : > { %s276_s14 = scalar_lea.vmem (%p835_p3), [#allocation3], %s666_s13  ;;  %v300_v7 = vld [vmem:[%s277_s12 + $0x6] sm:$0x1] (%p835_p3) }
  0x18   : > { %295 = vst [vmem:[%s276_s14] sm:$0x1] (%p835_p3), %v294_v4 }
  0x19   : > { %297 = vst [vmem:[%s276_s14 + $0x1] sm:$0x1] %v296_v5 }
  0x1a   : > { %299 = vst [vmem:[%s276_s14 + $0x2] sm:$0x1] %v298_v6 }
  0x1b   : > { %301 = vst [vmem:[%s276_s14 + $0x3] sm:$0x1] %v300_v7 }
  0x1c PF: > { %p667_p6 = scmp.ge.s32.totalorder %s772_s22, 1  ;;  %p324_p7 = scmp.lt.s32.totalorder %s772_s22, 3 }
  0x1e   : > { %p325_p8 = pnand %p667_p6, %p324_p7 }
  0x1f   : > { %s331_s15 = sand.u32 (!%p325_p8), 1, %s756_s18   ;;  %p394_p9 = scmp.lt.s32.totalorder (!%p325_p8), %s764_s20, 1 }
  0x20   : > { %328 = sbr.rel (%p325_p8) target bundleno = 58 (0x3a), region = 96  ;;  %s668_s16 = sshll.u32 (!%p325_p8), %s331_s15, 2 }
  0x21   : > { %s333_s30 = scalar_lea.vmem (!%p325_p8), [#allocation2], %s668_s16  ;;  %s872_s6 = scalar_lea.vmem (!%p325_p8), [#allocation3], %s668_s16 }
  0x25   : > { %v410_v8 = vld [vmem:[%s918_s2] sm:$0xf]  ;;  %v674_v10 = vld [vmem:[%s918_s2 + $0x4] sm:$0xf]  ;;  %v727_v13 = vld [vmem:[%s872_s6] ss:$0 sm:$0xff] }
  0x26   : > { %v411_v9 = vld [vmem:[%s919_s3] sm:$0xf]  ;;  %v675_v11 = vld [vmem:[%s919_s3 + $0x4] sm:$0xf]  ;;  %v678_v15 = vld [vmem:[%s918_s2 + $0x8] sm:$0xf]  ;;  %v424_v20 = vmul.f32 %v727_v13, %v410_v8 }
  0x27   : > { %v726_v12 = vld [vmem:[%s333_s30] ss:$0 sm:$0xff]  ;;  %v728_v14 = vld [vmem:[%s333_s30 + $0x1] ss:$0 sm:$0xff]  ;;  %v420_v17 = vmul.f32 %v727_v13, %v411_v9  ;;  %v729_v18 = vld [vmem:[%s872_s6 + $0x1] ss:$0 sm:$0xff] }
  0x28   : > { %v415_v16 = vmul.f32 %v726_v12, %v410_v8  ;;  %v422_v19 = vmul.f32 %v726_v12, %v411_v9  ;;  %v437_v21 = vmul.f32 %v728_v14, %v674_v10  ;;  %v679_v22 = vld [vmem:[%s919_s3 + $0x8] sm:$0xf]  ;;  %v730_v23 = vld [vmem:[%s333_s30 + $0x2] ss:$0 sm:$0xff]  ;;  %v444_v24 = vmul.f32 %v728_v14, %v675_v11  ;;  %v732_v32 = vld [vmem:[%s333_s30 + $0x3] ss:$0 sm:$0xff] }
  0x29   : > { %v442_v26 = vmul.f32 %v729_v18, %v675_v11  ;;  %v731_v27 = vld [vmem:[%s872_s6 + $0x2] ss:$0 sm:$0xff]  ;;  %v446_v29 = vmul.f32 %v729_v18, %v674_v10  ;;  %v459_v31 = vmul.f32 %v730_v23, %v678_v15  ;;  %v466_v34 = vmul.f32 %v730_v23, %v679_v22  ;;  %s930_s20 = smov (!%p394_p9, %s764_s20), 1  ;;  %v733_v39 = vld [vmem:[%s872_s6 + $0x3] ss:$0 sm:$0xff] }
  0x2a   : > { %v421_v25 = vsub.f32 %v415_v16, %v420_v17  ;;  %v425_v28 = vadd.f32 %v424_v20, %v422_v19  ;;  %v682_v35 = vld [vmem:[%s918_s2 + $0xc] sm:$0xf]  ;;  %v464_v38 = vmul.f32 %v731_v27, %v679_v22  ;;  %v468_v41 = vmul.f32 %v731_v27, %v678_v15  ;;  %s670_s16 = sshll.u32 %s930_s20, 2 }
  0x2b   : > { %v683_v36 = vld [vmem:[%s919_s3 + $0xc] sm:$0xf]  ;;  %v481_v43 = vmul.f32 %v732_v32, %v682_v35  ;;  %v490_v49 = vmul.f32 %v733_v39, %v682_v35  ;;  %s400_s25 = scalar_lea.vmem %s920_s4, %s670_s16  ;;  %s407_s29 = scalar_lea.vmem %s921_s5, %s670_s16 }
  0x2c   : > { %v438_v30 = vadd.f32 %v437_v21, %v421_v25  ;;  %v445_v33 = vadd.f32 %v444_v24, %v425_v28  ;;  %v488_v45 = vmul.f32 %v732_v32, %v683_v36  ;;  %v486_v47 = vmul.f32 %v733_v39, %v683_v36 }
  0x2e   : > { %v443_v37 = vsub.f32 %v438_v30, %v442_v26  ;;  %v447_v40 = vadd.f32 %v446_v29, %v445_v33 }
  0x30   : > { %v460_v42 = vadd.f32 %v459_v31, %v443_v37  ;;  %v467_v44 = vadd.f32 %v466_v34, %v447_v40 }
  0x32   : > { %v465_v46 = vsub.f32 %v460_v42, %v464_v38  ;;  %v469_v48 = vadd.f32 %v468_v41, %v467_v44 }
  0x34   : > { %v482_v50 = vadd.f32 %v481_v43, %v465_v46  ;;  %v489_v51 = vadd.f32 %v488_v45, %v469_v48 }
  0x36   : > { %v487_v52 = vsub.f32 %v482_v50, %v486_v47  ;;  %v491_v53 = vadd.f32 %v490_v49, %v489_v51 }
  0x38   : > { %492 = vst [vmem:[%s400_s25] sm:$0xf] %v487_v52 }
  0x39   : > { %493 = vst [vmem:[%s407_s29] sm:$0xf] %v491_v53 }
  0x3a PF: > { %s16_s22 = sadd.s32 1, %s772_s22   ;;  %s923_s18 = smov %s760_s19 }
  0x3b   : > { %p13_p10 = scmp.ge.s32.totalorder %s16_s22, 4   ;;  %s924_s19 = smov %s843_s27 }
  0x3c   : > { %s925_s20 = smov %s768_s21  ;;  %s926_s21 = smov %s928_s23 }
  0x3d   :  { %15 = sbr.rel (!%p13_p10) target bundleno = 3 (0x3), region = 177 }

// kernel: fno_block_forward.5
= control target key start
LH: loop header
LB: loop body
LE: loop exit
PB: predicated region body
PF: predicated region fallthrough
CT: control target
= control target key end

     0   :  { %v199_v2 = vmov 0   ;;  %vm50_vm0 = vcmask 1041408   ;;  %vm46_vm1 = vcmask 31744   ;;  %vm174_vm2 = vcmask 1043456   ;;  %s253_s0 = inlined_call_operand.vmem [shape: f32[4,512], index: 0, kind: input, shape index: {}]   ;;  %s254_s3 = inlined_call_operand.vmem [shape: f32[4,1], index: 3, kind: input, shape index: {}]   ;;  %s255_s1 = inlined_call_operand.vmem [shape: f32[4,512], index: 1, kind: input, shape index: {}]   ;;  %s256_s2 = inlined_call_operand.vmem [shape: bf16[4,4], index: 2, kind: input, shape index: {}]   ;;  %s257_s4 = inlined_call_operand.vmem [shape: f32[4,512], index: 4, kind: output, shape index: {}]  }
   0x1   :  { %v18_v0 = vld [vmem:[%s253_s0] sm:$0xff]  ;;  %v19_v1 = vld [vmem:[%s253_s0 + $0x8] sm:$0xff]  ;;  %190 = vset.pattern.permute.xlu0 %v199_v2 }
   0x2   :  { %26 = vst [vmem:[#allocation1] ss:$2 sm:$0xff] %v18_v0  ;;  %v23_v3 = vld [vmem:[%s254_s3] sm:$0xf]  ;;  %v21_v5 = vld [vmem:[%s255_s1 + $0x8] sm:$0xff] }
   0x3   :  { %28 = vst [vmem:[#allocation1 + $0x10] ss:$2 sm:$0xff] %v19_v1  ;;  %43 = vperm.xlu0 %190, %v23_v3   ;;  %v20_v4 = vld [vmem:[%s255_s1] sm:$0xff] }
   0x4   :  { %v22_v17 = vld [vmem:[%s256_s2] sm:$0x3] }
   0x9   :  { %v29_v6 = vld.sshfl [vmem:[#allocation1] sm:$0xff pattern:$0x75316420]  ;;  %v30_v7 = vld.sshfl [vmem:[#allocation1 + $0x8] sm:$0xff pattern:$0x75316420] }
   0xa   :  { %v37_v8 = vpack.c.bf16 %v29_v6, %v29_v6  ;;  %v38_v9 = vpack.c.bf16 %v30_v7, %v30_v7  ;;  %117 = vst [vmem:[#allocation1] ss:$2 sm:$0xff] %v20_v4  ;;  %v31_v10 = vld.sshfl [vmem:[#allocation1 + $0x10] sm:$0xff pattern:$0x75316420] }
   0xb   :  { %v39_v11 = vpack.c.bf16 %v31_v10, %v31_v10  ;;  %v32_v12 = vld.sshfl [vmem:[#allocation1 + $0x18] sm:$0xff pattern:$0x75316420] }
   0xc   :  { %v52_v13 = vsel %vm50_vm0, %v37_v8, 0  ;;  %v55_v14 = vsel %vm50_vm0, %v38_v9, 0  ;;  %v40_v15 = vpack.c.bf16 %v32_v12, %v32_v12  ;;  %119 = vst [vmem:[#allocation1 + $0x10] ss:$2 sm:$0xff] %v21_v5 }
   0xd   :  { %70 = vmatpush.bf16.msra.mxu0 %v52_v13  ;;  %83 = vmatpush.bf16.msra.mxu1 %v55_v14  ;;  %v58_v16 = vsel %vm50_vm0, %v39_v11, 0 }
   0xe   :  { %96 = vmatpush.bf16.msra.mxu2 %v58_v16  ;;  %v61_v18 = vsel %vm50_vm0, %v40_v15, 0 }
   0xf   :  { %109 = vmatpush.bf16.msra.mxu3 %v61_v18 }
  0x10   :  { %185 = vmatmul.msk.bf16.vlgmr.msra.gmra.mxu0 %vm46_vm1, %v22_v17  ;;  %186 = vmatmul.msk.bf16.vlgmr.msra.gmra.mxu1 %vm46_vm1, %v22_v17 }
  0x11   :  { %187 = vmatmul.msk.bf16.vlgmr.msra.gmra.mxu2 %vm46_vm1, %v22_v17  ;;  %v120_v21 = vld.sshfl [vmem:[#allocation1] sm:$0xff pattern:$0x75316420]  ;;  %v121_v23 = vld.sshfl [vmem:[#allocation1 + $0x8] sm:$0xff pattern:$0x75316420] }
  0x12   :  { %188 = vmatmul.msk.bf16.vlgmr.msra.gmra.mxu3 %vm46_vm1, %v22_v17 }
  0x13   :  { %v122_v33 = vld.sshfl [vmem:[#allocation1 + $0x10] sm:$0xff pattern:$0x75316420]  ;;  %v123_v36 = vld.sshfl [vmem:[#allocation1 + $0x18] sm:$0xff pattern:$0x75316420] }
  0x75   :  { %v44_v19 = vpop.permute.xlu0 %43 }
  0x8d   :  { %v72_v20 = vpop.f32.mrf.mxu0  ;;  %v85_v22 = vpop.f32.mrf.mxu1 }
  0x8e   :  { %v73_v24 = vadd.f32 %v72_v20, %v44_v19  ;;  %v86_v25 = vadd.f32 %v85_v22, %v44_v19 }
  0x90   :  { %v128_v26 = vadd.f32 %v120_v21, %v73_v24  ;;  %v129_v27 = vadd.f32 %v121_v23, %v86_v25 }
  0x92   :  { %v136_v28 = vmul.f32 %v128_v26, %v128_v26  ;;  %v137_v29 = vmul.f32 %v129_v27, %v129_v27  ;;  %v133_v63 = vmul.f32 0.5, %v129_v27  ;;  %v132_v1 = vmul.f32 0.5, %v128_v26 }
  0x94   :  { %v140_v30 = vmul.f32 %v136_v28, %v128_v26  ;;  %v141_v31 = vmul.f32 %v137_v29, %v129_v27  ;;  %v98_v32 = vpop.f32.mrf.mxu2 }
  0x95   :  { %v99_v34 = vadd.f32 %v98_v32, %v44_v19  ;;  %v111_v35 = vpop.f32.mrf.mxu3  ;;  %v74_v37 = vpop.f32.mrf.mxu0 }
  0x96   :  { %v144_v38 = vmul.f32 0.044715, %v140_v30  ;;  %v145_v39 = vmul.f32 0.044715, %v141_v31  ;;  %v112_v40 = vadd.f32 %v111_v35, %v44_v19  ;;  %v87_v41 = vpop.f32.mrf.mxu1 }
  0x97   :  { %v130_v42 = vadd.f32 %v122_v33, %v99_v34 }
  0x98   :  { %v148_v43 = vadd.f32 %v144_v38, %v128_v26  ;;  %v149_v44 = vadd.f32 %v145_v39, %v129_v27  ;;  %v131_v45 = vadd.f32 %v123_v36, %v112_v40 }
  0x99   :  { %v138_v46 = vmul.f32 %v130_v42, %v130_v42  ;;  %v134_v11 = vmul.f32 0.5, %v130_v42 }
  0x9a   :  { %v152_v47 = vmul.f32 0.7978846, %v148_v43  ;;  %v153_v48 = vmul.f32 0.7978846, %v149_v44  ;;  %v139_v49 = vmul.f32 %v131_v45, %v131_v45  ;;  %v135_v9 = vmul.f32 0.5, %v131_v45 }
  0x9b   :  { %v142_v50 = vmul.f32 %v138_v46, %v130_v42 }
  0x9c   :  { %191 = vtanh.f32 %v152_v47  ;;  %v143_v51 = vmul.f32 %v139_v49, %v131_v45  ;;  %v100_v52 = vpop.f32.mrf.mxu2 }
  0x9d   :  { %193 = vtanh.f32 %v153_v48  ;;  %v146_v53 = vmul.f32 0.044715, %v142_v50  ;;  %v113_v54 = vpop.f32.mrf.mxu3 }
  0x9e   :  { %v147_v55 = vmul.f32 0.044715, %v143_v51 }
  0x9f   :  { %v150_v56 = vadd.f32 %v146_v53, %v130_v42 }
  0xa0   :  { %v151_v57 = vadd.f32 %v147_v55, %v131_v45 }
  0xa1   :  { %v154_v58 = vmul.f32 0.7978846, %v150_v56 }
  0xa2   :  { %v192_v59 = vpop.eup %191  ;;  %v155_v60 = vmul.f32 0.7978846, %v151_v57 }
  0xa3   :  { %v194_v61 = vpop.eup %193  ;;  %195 = vtanh.f32 %v154_v58  ;;  %v160_v62 = vadd.f32 1.0, %v192_v59 }
  0xa4   :  { %v161_v0 = vadd.f32 1.0, %v194_v61  ;;  %197 = vtanh.f32 %v155_v60 }
  0xa5   :  { %v164_v3 = vmul.f32 %v160_v62, %v132_v1 }
  0xa6   :  { %v165_v2 = vmul.f32 %v161_v0, %v133_v63 }
  0xa8   :  { %v172_v4 = vrot.slane %v165_v2, 4 }
  0xa9   :  { %v196_v5 = vpop.eup %195 }
  0xaa   :  { %v198_v6 = vpop.eup %197  ;;  %v175_v7 = vsel %vm174_vm2, %v164_v3, %v172_v4  ;;  %v162_v8 = vadd.f32 1.0, %v196_v5 }
  0xab   :  { %179 = vst [vmem:[%s257_s4] sm:$0xff] %v175_v7  ;;  %v163_v10 = vadd.f32 1.0, %v198_v6 }
  0xac   :  { %v166_v13 = vmul.f32 %v162_v8, %v134_v11 }
  0xad   :  { %v167_v12 = vmul.f32 %v163_v10, %v135_v9 }
  0xaf   :  { %v173_v14 = vrot.slane %v167_v12, 4 }
  0xb1   :  { %v176_v15 = vsel %vm174_vm2, %v166_v13, %v173_v14 }
  0xb2   :  { %180 = vst [vmem:[%s257_s4 + $0x8] sm:$0xff] %v176_v15 }

</bundles_post_ra>
